<compile_context>
chip_gen: v5e
topology: v5e:2x2
jax: 0.10.0
libtpu: 0.0.40
codegen_flags: <defaults>
</compile_context>

<pallas_src>
import functools

import jax
import jax.numpy as jnp
from jax import lax
from jax.experimental import pallas as pl
from jax.experimental.pallas import tpu as pltpu

_LANE_CANDIDATES = (8192, 4096, 2048, 1024, 512, 256, 128)
_TARGET_BLOCK_BYTES = 2 * 1024 * 1024  # ~2 MiB per block


def _drop_relu_train_kernel(x_ref, o_ref, *, thr_i31, seed_mix):
    x = x_ref[...]
    rblk, lanes = x.shape
    i = pl.program_id(0)

    # Global linear element index of every lane in this block.
    row = lax.broadcasted_iota(jnp.int32, x.shape, 0)
    col = lax.broadcasted_iota(jnp.int32, x.shape, 1)
    idx = (i * rblk + row) * lanes + col

    # Counter-based hash -> uniform bits (int32 wrap is well-defined in XLA).
    h = idx ^ jnp.int32(seed_mix)
    for _ in range(2):  # two murmur3-fmix32 style rounds
        h = h ^ lax.shift_right_logical(h, 16)
        h = h * jnp.int32(0x7FEB352D)
        h = h ^ lax.shift_right_logical(h, 15)
        h = h * jnp.int32(-2073195893)  # 0x846CA68B as int32
        h = h ^ lax.shift_right_logical(h, 16)
    u31 = h & jnp.int32(0x7FFFFFFF)          # uniform in [0, 2^31)
    keep = u31 < jnp.int32(thr_i31)          # P(keep) == keep_prob

    # m==1 -> relu(x), m==0 -> x  ==>  only negatives with m==1 become 0.
    o_ref[...] = jnp.where(jnp.logical_and(keep, x < 0), jnp.zeros_like(x), x)


def _drop_relu_eval_kernel(x_ref, o_ref, *, keep_prob):
    x = x_ref[...]
    scale = jnp.asarray(1.0 - keep_prob, dtype=x.dtype)
    # (1-p)*x + p*relu(x)  ==  x where x>=0 else (1-p)*x
    o_ref[...] = jnp.where(x >= 0, x, x * scale)


def _choose_layout(n, itemsize):
    """Pick a lane-dense (rows, width) view of n elements and a block size."""
    width = None
    for w in _LANE_CANDIDATES:
        if n >= w and n % w == 0:
            width = w
            break
    pad = 0
    if width is None:
        if n < 128:
            width = n  # tiny tensor: one full-dim block, no padding
        else:
            width = 1024 if n >= 1024 else 128
            pad = (-n) % width  # rare fallback: one pad copy
    rows = (n + pad) // width
    target_rows = max(1, _TARGET_BLOCK_BYTES // (width * itemsize))
    if rows <= target_rows:
        block_rows = rows  # full first dim (always legal)
    else:
        block_rows = max(8, (target_rows // 8) * 8)  # multiple of 8
    return width, pad, rows, block_rows


def drop_relu(x, keep_prob=0.95, *, training=False, seed=0):
    """Pallas implementation of dropRelu.forward.  x: any-shape float array."""
    orig_shape = x.shape
    dtype = x.dtype
    n = x.size
    if n == 0:
        return x
    itemsize = jnp.dtype(dtype).itemsize
    width, pad, rows, block_rows = _choose_layout(n, itemsize)

    flat = x.reshape(-1)
    if pad:
        flat = jnp.pad(flat, (0, pad))
    x2d = flat.reshape(rows, width)

    grid = (pl.cdiv(rows, block_rows),)
    spec = pl.BlockSpec((block_rows, width), lambda i: (i, 0))
    out_shape = jax.ShapeDtypeStruct((rows, width), dtype)

    if training:
        thr = min(int(round(float(keep_prob) * 2147483648.0)), 2147483647)
        seed_mix = (int(seed) * 0x9E3779B9) & 0xFFFFFFFF
        if seed_mix >= 0x80000000:
            seed_mix -= 0x100000000
        kernel = functools.partial(
            _drop_relu_train_kernel, thr_i31=thr, seed_mix=seed_mix)
    else:
        kernel = functools.partial(
            _drop_relu_eval_kernel, keep_prob=float(keep_prob))

    out2d = pl.pallas_call(
        kernel,
        out_shape=out_shape,
        grid=grid,
        in_specs=[spec],
        out_specs=spec,
        compiler_params=pltpu.CompilerParams(
            dimension_semantics=("parallel",)),
    )(x2d)

    out = out2d.reshape(-1)
    if pad:
        out = out[:n]
    return out.reshape(orig_shape)


if __name__ == "__main__":
    key = jax.random.PRNGKey(0)
    # NCHW input, small shapes: batch=2, channels=4, spatial=16x16
    x = jax.random.normal(key, (2, 4, 16, 16), dtype=jnp.float32)
    keep_prob = 0.95

    # --- eval mode (deterministic): check against pure-JAX reference ---
    out_eval = jax.block_until_ready(drop_relu(x, keep_prob, training=False))
    ref_eval = (1.0 - keep_prob) * x + keep_prob * jnp.maximum(x, 0.0)
    assert jnp.allclose(out_eval, ref_eval, atol=1e-6), "eval mismatch"

    # --- training mode (stochastic): each element is either x or relu(x) ---
    out_train = jax.block_until_ready(
        drop_relu(x, keep_prob, training=True, seed=1234))
    relu_x = jnp.maximum(x, 0.0)
    is_identity = out_train == x
    is_relu = out_train == relu_x
    assert bool(jnp.all(is_identity | is_relu)), "training output invalid"

    # Mask should actually fire: some negatives zeroed, some kept (p=0.95).
    neg = x < 0
    zeroed_neg = neg & (out_train == 0) & (x != 0)
    kept_neg = neg & (out_train == x)
    assert bool(jnp.any(zeroed_neg)), "no activation was dropped to relu"
    assert bool(jnp.any(kept_neg)), "mask looks degenerate (all dropped)"

    print("KERNEL_OK")
</pallas_src>

<mosaic_0001>
module attributes {stable_mosaic.version = 11 : i64} {
  func.func @_drop_relu_eval_kernel(%arg0: i32, %arg1: memref<1x2048xf32, #tpu.memory_space<vmem>>, %arg2: memref<1x2048xf32, #tpu.memory_space<vmem>>) attributes {dimension_semantics = [#tpu.dimension_semantics<parallel>], iteration_bounds = array<i64: 1>, scalar_prefetch = 0 : i64, scratch_operands = 0 : i64, tpu.core_type = #tpu.core_type<tc>, window_params = [{transform_indices = @transform_0, window_bounds = array<i64: 1, 2048>}, {transform_indices = @transform_1, window_bounds = array<i64: 1, 2048>}]} {
    %c0 = arith.constant 0 : index
    %c0_0 = arith.constant 0 : index
    %0 = vector.load %arg1[%c0, %c0_0] : memref<1x2048xf32, #tpu.memory_space<vmem>>, vector<1x2048xf32>
    %cst = arith.constant 0.000000e+00 : f32
    %1 = vector.broadcast %cst : f32 to vector<1x2048xf32>
    %2 = arith.cmpf oge, %0, %1 : vector<1x2048xf32>
    %cst_1 = arith.constant 5.000000e-02 : f32
    %3 = vector.broadcast %cst_1 : f32 to vector<1x2048xf32>
    %4 = arith.mulf %0, %3 : vector<1x2048xf32>
    %5 = arith.select %2, %0, %4 : vector<1x2048xi1>, vector<1x2048xf32>
    %c0_2 = arith.constant 0 : index
    %c0_3 = arith.constant 0 : index
    %6 = vector.load %arg2[%c0_2, %c0_3] : memref<1x2048xf32, #tpu.memory_space<vmem>>, vector<1x2048xf32>
    tpu.vector_store %arg2[%c0_2, %c0_3], %5 {strides = array<i32>} : memref<1x2048xf32, #tpu.memory_space<vmem>>, vector<1x2048xf32>,
    return
  }
  func.func @transform_0(%arg0: i32) -> (i32, i32) {
    %c0_i32 = arith.constant 0 : i32
    %c0_i32_0 = arith.constant 0 : i32
    return %arg0, %c0_i32 : i32, i32
  }
  func.func @transform_1(%arg0: i32) -> (i32, i32) {
    %c0_i32 = arith.constant 0 : i32
    %c0_i32_0 = arith.constant 0 : i32
    return %arg0, %c0_i32 : i32, i32
  }
}

</mosaic_0001>

<bundles_post_ra>
// kernel: tpu_custom_call.1
= control target key start
LH: loop header
LB: loop body
LE: loop exit
PB: predicated region body
PF: predicated region fallthrough
CT: control target
= control target key end

     0   :  { %6 = vsyncpa [#allocation3], 0  ;;  %s122_s0 = inlined_call_operand.hbm [shape: f32[1,2048], index: 0, kind: input, shape index: {}]   ;;  %s123_s1 = inlined_call_operand.hbm [shape: f32[1,2048], index: 1, kind: output, shape index: {}]  }
   0x1   :  { %7 = vsyncpa [#allocation4], 0  ;;  %s13_s8 = sshll.u32 %s122_s0, 4  ;;  %s104_s9 = smov [#allocation2]   ;;  %s14_s8 = int_to_ptr.hbm [resolvable:$true] %s13_s8 }
   0x2   :  { %s15_s10 = sshll.u32 %s104_s9, 4  ;;  %s16_s10 = int_to_ptr.vmem [resolvable:$true] %s15_s10 }
   0x3   :  { %18 = dma.hbm_to_vmem [thread:$0]  %s14_s8, 256, %s16_s10, [#allocation3]  }
   0x4   :  { %100 = dma.done.wait [#allocation3], 256  }
   0x5   :  { %101 = vsyncadd [#allocation3], 4294967040  ;;  %v23_v0 = vld [vmem:[#allocation2] sm:$0xff]  ;;  %v24_v1 = vld [vmem:[#allocation2 + $0x8] sm:$0xff]  ;;  %s105_s11 = smov [#allocation5]   ;;  %s40_s15 = sshll.u32 %s123_s1, 4  ;;  %s41_s15 = int_to_ptr.hbm [resolvable:$true] %s40_s15 }
   0x6   :  { %s38_s12 = sshll.u32 %s105_s11, 4  ;;  %vm25_vm0 = vcmp.ge.f32.partialorder %v23_v0, 0.0  ;;  %v27_v2 = vmul.f32 0.05, %v23_v0  ;;  %vm26_vm1 = vcmp.ge.f32.partialorder %v24_v1, 0.0  ;;  %s39_s12 = int_to_ptr.vmem [resolvable:$true] %s38_s12 }
   0x7   :  { %v28_v3 = vmul.f32 0.05, %v24_v1 }
   0x8   :  { %v29_v4 = vsel %vm25_vm0, %v23_v0, %v27_v2 }
   0x9   :  { %v30_v5 = vsel %vm26_vm1, %v24_v1, %v28_v3  ;;  %31 = vst [vmem:[#allocation5] sm:$0xff] %v29_v4 }
   0xa   :  { %32 = vst [vmem:[#allocation5 + $0x8] sm:$0xff] %v30_v5 }
   0xb   :  { %43 = dma.vmem_to_hbm [thread:$0]  %s39_s12, 256, %s41_s15, [#allocation4]  }
   0xc   :  { %102 = dma.done.wait [#allocation4], 256  }
   0xd   :  { %103 = vsyncadd [#allocation4], 4294967040 }
   0xe   :  { %48 = vsyncpa [#allocation3], 1 }
   0xf   :  { %49 = vsyncpa [#allocation4], 1 }

</bundles_post_ra>
